<compile_context>
chip_gen: v7x
topology: tpu7x:2x2x1
jax: 0.10.0
libtpu: 0.0.40
codegen_flags: <defaults>
</compile_context>

<pallas_src>
import math

import jax
import jax.numpy as jnp
from jax import lax
from jax.experimental import pallas as pl
from jax.experimental.pallas import tpu as pltpu


def _fused_segnet_kernel(p_ref, w1t_ref, b1_ref, w2t_ref, b2_ref, o_ref):
    """One batch element per grid step, everything channels-on-sublanes.

    p_ref   : (1, 9*CIN, H*W)   im2col patches (lane-dense, lanes = H*W)
    w1t_ref : (HID, 9*CIN)      conv3x3 weights, flattened & transposed
    b1_ref  : (HID, 1)          conv3x3 bias (column)
    w2t_ref : (COUT, HID)       expanded 1x1 head weights, transposed
    b2_ref  : (COUT, 1)         expanded 1x1 head bias (column)
    o_ref   : (1, COUT, H*W)    output logits (lane-dense)
    """
    # conv3x3 (pad already folded into the patches) as ONE MXU matmul
    h = jnp.dot(w1t_ref[...], p_ref[0], preferred_element_type=jnp.float32)
    h = jnp.maximum(h + b1_ref[...], 0.0)                     # (HID, H*W)

    # expanded segmentation head: 1x1 conv == channel matmul + bias
    logits = jnp.dot(w2t_ref[...], h,
                     preferred_element_type=jnp.float32) + b2_ref[...]
    o_ref[0] = logits                                          # (COUT, H*W)


def continual_model_forward(x_nchw, params):
    """Runs the expanded base model.  x_nchw: (N, Cin, H, W) float32."""
    w1, b1, w2, b2 = params  # w1:(3,3,Cin,HID) b1:(HID,) w2:(HID,COUT) b2:(COUT,)
    N, CIN, H, W = x_nchw.shape
    HID = w1.shape[-1]
    COUT = w2.shape[-1]
    HW = H * W
    K9 = 9 * CIN

    # --- wrapper-side im2col (lane-dense: channels/taps on sublanes, H*W on lanes)
    xp = jnp.pad(x_nchw, ((0, 0), (0, 0), (1, 1), (1, 1)))     # (N, CIN, H+2, W+2)
    taps = []
    for dy in range(3):
        for dx in range(3):
            taps.append(xp[:, :, dy:dy + H, dx:dx + W].reshape(N, CIN, HW))
    patches = jnp.concatenate(taps, axis=1)                    # (N, 9*CIN, H*W)

    # weights reshaped to match the (tap-major, channel-minor) patch ordering
    w1t = jnp.transpose(w1.reshape(K9, HID))                   # (HID, 9*CIN)
    w2t = jnp.transpose(w2)                                    # (COUT, HID)
    b1_col = b1.reshape(HID, 1)
    b2_col = b2.reshape(COUT, 1)

    out = pl.pallas_call(
        _fused_segnet_kernel,
        out_shape=jax.ShapeDtypeStruct((N, COUT, HW), jnp.float32),
        grid_spec=pltpu.PrefetchScalarGridSpec(
            num_scalar_prefetch=0,
            grid=(N,),
            in_specs=[
                pl.BlockSpec((1, K9, HW), lambda n: (n, 0, 0)),
                pl.BlockSpec((HID, K9), lambda n: (0, 0)),
                pl.BlockSpec((HID, 1), lambda n: (0, 0)),
                pl.BlockSpec((COUT, HID), lambda n: (0, 0)),
                pl.BlockSpec((COUT, 1), lambda n: (0, 0)),
            ],
            out_specs=pl.BlockSpec((1, COUT, HW), lambda n: (n, 0, 0)),
        ),
        compiler_params=pltpu.CompilerParams(
            dimension_semantics=("parallel",)),
    )(patches, w1t, b1_col, w2t, b2_col)

    # (N, COUT, H*W) -> NCHW is a pure reshape (no transpose / HBM shuffle)
    return out.reshape(N, COUT, H, W)


def make_params(key, cin, hid, num_classes_old, num_classes_new):
    """Deterministically builds the base-model params and performs the same
    final-layer expansion ContinualLearningModel does."""
    num_classes_total = num_classes_old + num_classes_new - 1
    k1, k2, k3, k4 = jax.random.split(key, 4)

    # base conv3x3 (HWIO) + bias
    fan_in1 = 3 * 3 * cin
    w1 = jax.random.normal(k1, (3, 3, cin, hid), jnp.float32) * math.sqrt(2.0 / fan_in1)
    b1 = jnp.zeros((hid,), jnp.float32)

    # old segmentation head: 1x1 conv, hid -> num_classes_old  (stored as (HID, Cout))
    w2_old = jax.random.normal(k2, (hid, num_classes_old), jnp.float32) * math.sqrt(2.0 / hid)
    b2_old = jax.random.normal(k3, (num_classes_old,), jnp.float32) * 0.01

    # _create_expanded_layer: copy old cols, kaiming-normal new cols, zero new bias
    w2_new_cols = jax.random.normal(
        k4, (hid, num_classes_total - num_classes_old), jnp.float32) * math.sqrt(2.0 / hid)
    w2 = jnp.concatenate([w2_old, w2_new_cols], axis=1)
    b2 = jnp.concatenate(
        [b2_old, jnp.zeros((num_classes_total - num_classes_old,), jnp.float32)], axis=0)

    return (w1, b1, w2, b2), num_classes_total


def reference_forward(x_nchw, params):
    """Plain-JAX reference of the same base model (for validation)."""
    w1, b1, w2, b2 = params
    x_nhwc = jnp.transpose(x_nchw, (0, 2, 3, 1))
    h = lax.conv_general_dilated(
        x_nhwc, w1, window_strides=(1, 1), padding="SAME",
        dimension_numbers=("NHWC", "HWIO", "NHWC"))
    h = jnp.maximum(h + b1, 0.0)
    out = jnp.einsum("nhwc,cd->nhwd", h, w2) + b2
    return jnp.transpose(out, (0, 3, 1, 2))


if __name__ == "__main__":
    # small shapes consistent with the module's forward
    N, CIN, H, W = 2, 4, 16, 16
    HID = 32
    NUM_CLASSES_OLD, NUM_CLASSES_NEW = 5, 4   # total = 5 + 4 - 1 = 8

    key = jax.random.PRNGKey(0)
    kx, kp = jax.random.split(key)
    x = jax.random.normal(kx, (N, CIN, H, W), jnp.float32)

    params, num_classes_total = make_params(kp, CIN, HID,
                                            NUM_CLASSES_OLD, NUM_CLASSES_NEW)

    out = continual_model_forward(x, params)
    out = jax.block_until_ready(out)
    assert out.shape == (N, num_classes_total, H, W), out.shape

    ref = jax.block_until_ready(reference_forward(x, params))
    assert jnp.max(jnp.abs(out - ref)) < 1e-4, float(jnp.max(jnp.abs(out - ref)))

    print("KERNEL_OK")
</pallas_src>

<mosaic_0001>
module attributes {stable_mosaic.version = 11 : i64} {
  func.func @_fused_segnet_kernel(%arg0: i32, %arg1: memref<1x36x256xf32, #tpu.memory_space<vmem>>, %arg2: memref<32x36xf32, #tpu.memory_space<vmem>>, %arg3: memref<32x1xf32, #tpu.memory_space<vmem>>, %arg4: memref<8x32xf32, #tpu.memory_space<vmem>>, %arg5: memref<8x1xf32, #tpu.memory_space<vmem>>, %arg6: memref<1x8x256xf32, #tpu.memory_space<vmem>>) attributes {dimension_semantics = [#tpu.dimension_semantics<parallel>], iteration_bounds = array<i64: 2>, scalar_prefetch = 0 : i64, scratch_operands = 0 : i64, tpu.core_type = #tpu.core_type<tc>, window_params = [{transform_indices = @transform_0, window_bounds = array<i64: 1, 36, 256>}, {pipeline_mode = #tpu.pipeline_mode<synchronous>, transform_indices = @transform_1, window_bounds = array<i64: 32, 36>}, {pipeline_mode = #tpu.pipeline_mode<synchronous>, transform_indices = @transform_2, window_bounds = array<i64: 32, 1>}, {pipeline_mode = #tpu.pipeline_mode<synchronous>, transform_indices = @transform_3, window_bounds = array<i64: 8, 32>}, {pipeline_mode = #tpu.pipeline_mode<synchronous>, transform_indices = @transform_4, window_bounds = array<i64: 8, 1>}, {transform_indices = @transform_5, window_bounds = array<i64: 1, 8, 256>}]} {
    %c0 = arith.constant 0 : index
    %c0_0 = arith.constant 0 : index
    %0 = vector.load %arg2[%c0, %c0_0] : memref<32x36xf32, #tpu.memory_space<vmem>>, vector<32x36xf32>
    %c0_1 = arith.constant 0 : index
    %c0_2 = arith.constant 0 : index
    %c0_3 = arith.constant 0 : index
    %1 = vector.load %arg1[%c0_1, %c0_2, %c0_3] : memref<1x36x256xf32, #tpu.memory_space<vmem>>, vector<1x36x256xf32>
    %2 = vector.shape_cast %1 : vector<1x36x256xf32> to vector<36x256xf32>
    %cst = arith.constant dense<0.000000e+00> : vector<32x256xf32>
    %3 = tpu.matmul %0, %2, %cst {dimension_numbers = #tpu.dot_dimension_numbers<[1], [0], [0], [1], [0, 0, 1, 1], [], []>} : vector<32x36xf32>, vector<36x256xf32>, vector<32x256xf32> -> vector<32x256xf32>
    %c0_4 = arith.constant 0 : index
    %c0_5 = arith.constant 0 : index
    %4 = vector.load %arg3[%c0_4, %c0_5] : memref<32x1xf32, #tpu.memory_space<vmem>>, vector<32x1xf32>
    %5 = vector.broadcast %4 : vector<32x1xf32> to vector<32x256xf32>
    %6 = arith.addf %3, %5 : vector<32x256xf32>
    %cst_6 = arith.constant 0.000000e+00 : f32
    %7 = vector.broadcast %cst_6 : f32 to vector<32x256xf32>
    %8 = arith.maximumf %6, %7 : vector<32x256xf32>
    %c0_7 = arith.constant 0 : index
    %c0_8 = arith.constant 0 : index
    %9 = vector.load %arg4[%c0_7, %c0_8] : memref<8x32xf32, #tpu.memory_space<vmem>>, vector<8x32xf32>
    %cst_9 = arith.constant dense<0.000000e+00> : vector<8x256xf32>
    %10 = tpu.matmul %9, %8, %cst_9 {dimension_numbers = #tpu.dot_dimension_numbers<[1], [0], [0], [1], [0, 0, 1, 1], [], []>} : vector<8x32xf32>, vector<32x256xf32>, vector<8x256xf32> -> vector<8x256xf32>
    %c0_10 = arith.constant 0 : index
    %c0_11 = arith.constant 0 : index
    %11 = vector.load %arg5[%c0_10, %c0_11] : memref<8x1xf32, #tpu.memory_space<vmem>>, vector<8x1xf32>
    %12 = vector.broadcast %11 : vector<8x1xf32> to vector<8x256xf32>
    %13 = arith.addf %10, %12 : vector<8x256xf32>
    %c0_12 = arith.constant 0 : index
    %c0_13 = arith.constant 0 : index
    %c0_14 = arith.constant 0 : index
    %14 = vector.load %arg6[%c0_12, %c0_13, %c0_14] : memref<1x8x256xf32, #tpu.memory_space<vmem>>, vector<1x8x256xf32>
    %15 = vector.shape_cast %14 : vector<1x8x256xf32> to vector<8x256xf32>
    %16 = vector.shape_cast %13 : vector<8x256xf32> to vector<1x8x256xf32>
    tpu.vector_store %arg6[%c0_12, %c0_13, %c0_14], %16 {strides = array<i32>} : memref<1x8x256xf32, #tpu.memory_space<vmem>>, vector<1x8x256xf32>,
    return
  }
  func.func @transform_0(%arg0: i32) -> (i32, i32, i32) {
    %c0_i32 = arith.constant 0 : i32
    %c0_i32_0 = arith.constant 0 : i32
    %c0_i32_1 = arith.constant 0 : i32
    return %arg0, %c0_i32, %c0_i32_0 : i32, i32, i32
  }
  func.func @transform_1(%arg0: i32) -> (i32, i32) {
    %c0_i32 = arith.constant 0 : i32
    %c0_i32_0 = arith.constant 0 : i32
    %c0_i32_1 = arith.constant 0 : i32
    return %c0_i32, %c0_i32_0 : i32, i32
  }
  func.func @transform_2(%arg0: i32) -> (i32, i32) {
    %c0_i32 = arith.constant 0 : i32
    %c0_i32_0 = arith.constant 0 : i32
    %c0_i32_1 = arith.constant 0 : i32
    return %c0_i32, %c0_i32_0 : i32, i32
  }
  func.func @transform_3(%arg0: i32) -> (i32, i32) {
    %c0_i32 = arith.constant 0 : i32
    %c0_i32_0 = arith.constant 0 : i32
    %c0_i32_1 = arith.constant 0 : i32
    return %c0_i32, %c0_i32_0 : i32, i32
  }
  func.func @transform_4(%arg0: i32) -> (i32, i32) {
    %c0_i32 = arith.constant 0 : i32
    %c0_i32_0 = arith.constant 0 : i32
    %c0_i32_1 = arith.constant 0 : i32
    return %c0_i32, %c0_i32_0 : i32, i32
  }
  func.func @transform_5(%arg0: i32) -> (i32, i32, i32) {
    %c0_i32 = arith.constant 0 : i32
    %c0_i32_0 = arith.constant 0 : i32
    %c0_i32_1 = arith.constant 0 : i32
    return %arg0, %c0_i32, %c0_i32_0 : i32, i32, i32
  }
}

</mosaic_0001>

<bundles_post_ra>
// kernel: tpu_custom_call.1
= control target key start
LH: loop header
LB: loop body
LE: loop exit
PB: predicated region body
PF: predicated region fallthrough
CT: control target
= control target key end

     0   :  { %10 = vsyncpa [#allocation3], 0  ;;  %s842_s0 = inlined_call_operand.vmem [shape: f32[2,36,256], index: 0, kind: input, shape index: {}]   ;;  %s843_s1 = inlined_call_operand.vmem [shape: f32[32,36], index: 1, kind: input, shape index: {}]   ;;  %s844_s2 = inlined_call_operand.vmem [shape: f32[32,1], index: 2, kind: input, shape index: {}]   ;;  %s845_s3 = inlined_call_operand.vmem [shape: f32[8,32], index: 3, kind: input, shape index: {}]   ;;  %s846_s4 = inlined_call_operand.vmem [shape: f32[8,1], index: 4, kind: input, shape index: {}]   ;;  %s847_s5 = inlined_call_operand.hbm [shape: f32[2,8,256], index: 5, kind: output, shape index: {}]  }
   0x1   :  { %12 = vsyncpa [#allocation3 + $0x1], 0  ;;  %s712_s18 = smov 0   ;;  %s714_s19 = smov 0  }
   0x2   :  { %s716_s20 = smov 0   ;;  %s718_s21 = smov 0  }
   0x3 LB: > { %s733_s22 = sadd.s32 4294967295, %s677_s21   ;;  %s536_s23 = sadd.s32 4294967294, %s677_s21   ;;  %s677_s21 = sphi %s718_s21, %s853_s21   ;;  %s673_s20 = sphi %s716_s20, %s852_s20   ;;  %s669_s19 = sphi %s714_s19, %s851_s19   ;;  %s665_s18 = sphi %s712_s18, %s850_s18  }
   0x4   : > { %s737_s24 = sadd.s32 1, %s677_s21   ;;  %s135_s25 = sadd.s32 1, %s673_s20 }
   0x5   : > { %s132_s26 = ssub.s32 %s677_s21, %s737_s24  ;;  %p145_p0 = scmp.ne.s32.totalorder %s673_s20, %s669_s19 }
   0x6   : > { %p133_p1 = scmp.eq.s32.totalorder %s132_s26, 0  ;;  %p146_p2 = scmp.eq.s32.totalorder %s733_s22, 1 }
   0x7   : > { %p151_p3 = scmp.ne.s32.totalorder %s669_s19, %s665_s18  ;;  %p152_p4 = scmp.eq.s32.totalorder %s536_s23, 1 }
   0x8   : > { %s748_s27 = scalar_select %p133_p1, %s673_s20, %s135_s25  }
   0x9   : > { %p750_p5 = por %p146_p2, %p145_p0  ;;  %p754_p6 = por %p152_p4, %p151_p3 }
   0xa   : > { %p539_p7 = scmp.ge.s32.totalorder %s677_s21, 1  ;;  %p190_p8 = scmp.lt.s32.totalorder %s677_s21, 3 }
   0xc   : > { %p191_p9 = pnand %p539_p7, %p190_p8 }
   0xd   : > { %p218_p10 = scmp.lt.s32.totalorder (!%p191_p9), %s733_s22, 1  ;;  %v679_v0 = vmov (!%p191_p9), 0.0   ;;  %v237_v1 = vld [vmem:[%s844_s2] sm:$0xff] (!%p191_p9)  ;;  %v680_v2 = vmov (!%p191_p9), 0   ;;  %v239_v3 = vld [vmem:[%s844_s2 + $0x10] sm:$0xff] (!%p191_p9)  ;;  %v238_v4 = vld [vmem:[%s844_s2 + $0x8] sm:$0xff] (!%p191_p9) }
   0xe   : > { %194 = sbr.rel (%p191_p9) target bundleno = 503 (0x1f7), region = 40  ;;  %345 = vmatprep.mubr.f32.mxu0 (!%p191_p9), %v679_v0  ;;  %453 = vmatprep.mubr.f32.mxu1 (!%p191_p9), %v679_v0  ;;  %v240_v5 = vld [vmem:[%s844_s2 + $0x18] sm:$0xff] (!%p191_p9)  ;;  %v379_v6 = vld [vmem:[%s846_s4] sm:$0xff] (!%p191_p9)  ;;  %vm274_vm0 = vcmask (!%p191_p9), 1043456   ;;  %vm261_vm1 = vcmask (!%p191_p9), 293888   ;;  %v224_v22 = vld [vmem:[%s843_s1 + $0x8] sm:$0xff] (!%p191_p9) }
   0xf   : > { %613 = vset.pattern.permute.xlu0 (!%p191_p9), %v680_v2  ;;  %614 = vset.pattern.permute.xlu1 (!%p191_p9), %v680_v2  ;;  %v223_v21 = vld [vmem:[%s843_s1] sm:$0xff] (!%p191_p9)  ;;  %v225_v23 = vld [vmem:[%s843_s1 + $0x10] sm:$0xff] (!%p191_p9)  ;;  %v226_v24 = vld [vmem:[%s843_s1 + $0x18] sm:$0xff] (!%p191_p9)  ;;  %vm385_vm2 = vcmask (!%p191_p9), 261120   ;;  %s215_s14 = sand.u32 (!%p191_p9), 1, %s669_s19   ;;  %s554_s16 = sshll.u32 (!%p191_p9), %s733_s22, 8 }
  0x10   : > { %243 = vperm.xlu0 (!%p191_p9), %613, %v237_v1   ;;  %253 = vperm.xlu1 (!%p191_p9), %614, %v239_v3   ;;  %v378_v57 = vld [vmem:[%s845_s3] sm:$0xff] (!%p191_p9)  ;;  %s540_s15 = sshll.u32 (!%p191_p9), %s215_s14, 4  ;;  %s800_s30 = scalar_lea.hbm (!%p191_p9), %s847_s5, %s554_s16 }
  0x14   : > { %248 = vperm.xlu0 (!%p191_p9), %613, %v238_v4   ;;  %258 = vperm.xlu1 (!%p191_p9), %614, %v240_v5  }
  0x15   : > { %s219_s7 = scalar_select %p218_p10, %s733_s22, 1 }
  0x16   : > { %s463_s22 = scalar_lea.sflag [#allocation3], %s215_s14 }
  0x17   : > { %s571_s10 = smul.u32 80, %s219_s7  ;;  %s681_s7 = smov [#allocation2]  }
  0x18   : > { %382 = vperm.xlu0 %613, %v379_v6   ;;  %s619_s8 = sshll.u32 %s681_s7, 4  ;;  %s620_s8 = int_to_ptr.vmem [resolvable:$false] %s619_s8 }
  0x19   : > { %s222_s17 = scalar_lea.vmem %s842_s0, %s571_s10  ;;  %s621_s9 = scalar_lea.vmem %s620_s8, 512 }
  0x1a   : > { %v228_v7 = vld [vmem:[%s222_s17 + $0x8] sm:$0xff]  ;;  %v230_v8 = vld [vmem:[%s222_s17 + $0x18] sm:$0xff]  ;;  %v227_v9 = vld [vmem:[%s222_s17] sm:$0xff] }
  0x1b   : > { %v555_v10 = vpack.c.bf16 %v230_v8, %v228_v7  ;;  %v229_v11 = vld [vmem:[%s222_s17 + $0x10] sm:$0xff]  ;;  %v232_v12 = vld [vmem:[%s222_s17 + $0x28] sm:$0xff]  ;;  %v234_v13 = vld [vmem:[%s222_s17 + $0x38] sm:$0xff] }
  0x1c   : > { %v557_v14 = vpack.c.bf16 %v229_v11, %v227_v9  ;;  %v559_v15 = vpack.c.bf16 %v234_v13, %v232_v12  ;;  %v231_v16 = vld [vmem:[%s222_s17 + $0x20] sm:$0xff]  ;;  %v233_v17 = vld [vmem:[%s222_s17 + $0x30] sm:$0xff]  ;;  %v236_v19 = vld [vmem:[%s222_s17 + $0x48] sm:$0xf] }
  0x1d   : > { %556 = vmatprep.subr.bf16.mxu0 %v555_v10  ;;  %v561_v18 = vpack.c.bf16 %v233_v17, %v231_v16  ;;  %v235_v20 = vld [vmem:[%s222_s17 + $0x40] sm:$0xf]  ;;  %s217_s17 = scalar_lea.vmem [#allocation2], %s540_s15 }
  0x1e   : > { %558 = vmatpush1.bf16.msra.mxu0 %v557_v14  ;;  %s477_s23 = sshll.u32 %s217_s17, 4  ;;  %s802_s23 = int_to_ptr.vmem [resolvable:$true] %s477_s23 }
  0x1f   : > { %560 = vmatprep.subr.bf16.mxu0 %v559_v15  ;;  %s615_s6 = scalar_lea.vmem %s802_s23, 256  ;;  %p622_p0 = scmp.lt.s32.totalorder %s802_s23, %s620_s8 }
  0x20   : > { %p616_p11 = scmp.ne.s32.totalorder %s802_s23, %s615_s6  ;;  %p623_p1 = scmp.lt.s32.totalorder %s621_s9, %s615_s6 }
  0x22   : > { %562 = vmatpush1.bf16.msra.mxu0 %v561_v18  ;;  %p617_p12 = pnand %p616_p11, %p750_p5  ;;  %p624_p2 = por %p623_p1, %p622_p0 }
  0x23   : > { %542 = vmatprep.subr.msk.mxu0 %vm274_vm0, %v236_v19 }
  0x24   : > { %p618_p13 = pneg %p617_p12 }
  0x26   : > { %543 = vmatpush1.msk.msra.mxu0 %vm274_vm0, %v235_v20  ;;  %p625_p3 = pnand %p624_p2, %p618_p13 }
  0x27   : > { %544 = vmatmul.mubr.msk.f32.vlgmr.msra.gmra.mrb[0].mxu0 %vm261_vm1, %v223_v21 }
  0x28   : > { %351 = vmatprep.mubr.f32.mxu0 %v679_v0 }
  0x2b   : > { %545 = vmatmul.mubr.msk.f32.gmra.mrb[2].mxu0 %vm261_vm1, %v224_v22 }
  0x2c   : > { %357 = vmatprep.mubr.f32.mxu0 %v679_v0 }
  0x2f   : > { %546 = vmatmul.mubr.msk.f32.gmra.mrb[4].mxu0 %vm261_vm1, %v225_v23 }
  0x30   : > { %363 = vmatprep.mubr.f32.mxu0 %v679_v0 }
  0x33   : > { %547 = vmatmul.mubr.msk.f32.gmra.mrb[6].mxu0 %vm261_vm1, %v226_v24 }
  0x8f   : > { %v244_v25 = vpop.permute.xlu0 %243  ;;  %v254_v34 = vpop.permute.xlu1 %253 }
  0x93   : > { %v249_v29 = vpop.permute.xlu0 %248  ;;  %v259_v45 = vpop.permute.xlu1 %258 }
  0x97   : > { %v383_v58 = vpop.permute.xlu0 %382 }
  0xfa   : > { %v347_v26 = vpop.f32.mrb[0].mxu0 }
  0xfb   : > { %v349_v27 = vpop.f32.mrb[1].mxu0  ;;  %v348_v28 = vadd.f32 %v347_v26, %v244_v25 }
  0xfc   : > { %v350_v30 = vadd.f32 %v349_v27, %v244_v25 }
  0xfd   : > { %v370_v36 = vmax.f32 %v348_v28, 0.0 }
  0xfe   : > { %v353_v31 = vpop.f32.mrb[2].mxu0  ;;  %v371_v38 = vmax.f32 %v350_v30, 0.0 }
  0xff   : > { %v354_v32 = vadd.f32 %v353_v31, %v249_v29  ;;  %v355_v33 = vpop.f32.mrb[3].mxu0 }
 0x100   : > { %v356_v35 = vadd.f32 %v355_v33, %v249_v29 }
 0x101   : > { %v372_v37 = vmax.f32 %v354_v32, 0.0 }
 0x102   : > { %v373_v39 = vmax.f32 %v356_v35, 0.0  ;;  %v359_v40 = vpop.f32.mrb[4].mxu0 }
 0x103   : > { %v361_v41 = vpop.f32.mrb[5].mxu0  ;;  %v565_v42 = vpack.c.bf16 %v372_v37, %v370_v36  ;;  %v360_v44 = vadd.f32 %v359_v40, %v254_v34 }
 0x104   : > { %v563_v43 = vpack.c.bf16 %v373_v39, %v371_v38  ;;  %v362_v46 = vadd.f32 %v361_v41, %v254_v34 }
 0x105   : > { %v374_v51 = vmax.f32 %v360_v44, 0.0 }
 0x106   : > { %v365_v47 = vpop.f32.mrb[6].mxu0  ;;  %564 = vmatprep.subr.bf16.mxu1 %v563_v43  ;;  %v375_v53 = vmax.f32 %v362_v46, 0.0 }
 0x107   : > { %v366_v48 = vadd.f32 %v365_v47, %v259_v45  ;;  %v367_v49 = vpop.f32.mrb[7].mxu0  ;;  %566 = vmatpush1.bf16.msra.mxu1 %v565_v42 }
 0x108   : > { %v368_v50 = vadd.f32 %v367_v49, %v259_v45 }
 0x109   : > { %v376_v52 = vmax.f32 %v366_v48, 0.0 }
 0x10a   : > { %v377_v54 = vmax.f32 %v368_v50, 0.0 }
 0x10b   : > { %v569_v55 = vpack.c.bf16 %v376_v52, %v374_v51 }
 0x10c   : > { %v567_v56 = vpack.c.bf16 %v377_v54, %v375_v53 }
 0x10e   : > { %568 = vmatprep.subr.bf16.mxu1 %v567_v56 }
 0x10f   : > { %570 = vmatpush1.bf16.msra.mxu1 %v569_v55 }
 0x112   : > { %548 = vmatmul.mubr.msk.f32.vlgmr.msra.gmra.mrb[0].mxu1 %vm385_vm2, %v378_v57 }
 0x1e5   : > { %v455_v59 = vpop.f32.mrb[0].mxu1 }
 0x1e6   : > { %v456_v60 = vadd.f32 %v455_v59, %v383_v58  ;;  %v457_v61 = vpop.f32.mrb[1].mxu1 }
 0x1e7   : > { %v458_v62 = vadd.f32 %v457_v61, %v383_v58 }
 0x1e8   : > { %460 = vst [vmem:[%s217_s17] sm:$0xff] %v456_v60 }
 0x1e9   : > { %461 = vst [vmem:[%s217_s17 + $0x8] sm:$0xff] %v458_v62 }
 0x1ea   : > { %628 = shalt.err (!%p625_p3)
}
 0x1eb   : > { %s629_s10 = scalar_lea.hbm %s800_s30, 256  ;;  %s633_s13 = scalar_lea.hbm %s847_s5, 512 }
 0x1ec   : > { %p630_p4 = scmp.ne.s32.totalorder %s800_s30, %s629_s10  ;;  %p634_p9 = scmp.lt.u32.totalorder %s800_s30, %s847_s5 }
 0x1ed   : > { %p635_p10 = scmp.lt.u32.totalorder %s633_s13, %s629_s10  ;;  %p637_p12 = scmp.lt.u32.totalorder %s629_s10, %s800_s30 }
 0x1ee   : > { %p631_p7 = pnand %p630_p4, %p750_p5 }
 0x1ef   : > { %p636_p11 = por %p635_p10, %p634_p9 }
 0x1f0   : > { %p632_p8 = pneg %p631_p7 }
 0x1f1   : > { %p638_p13 = por %p637_p12, %p636_p11 }
 0x1f3   : > { %p639_p0 = pnand %p638_p13, %p632_p8 }
 0x1f5   : > { %642 = shalt.err (!%p639_p0)
}
 0x1f6   : > { %572 = dma.vmem_to_hbm [thread:$0]  (%p750_p5), %s802_s23, 256, %s800_s30, %s463_s22  }
 0x1f7 PF: > { %p578_p1 = scmp.ge.s32.totalorder %s677_s21, 2  ;;  %s489_s16 = sand.u32 1, %s665_s18  }
 0x1f8   : > { %s490_s17 = scalar_lea.sflag [#allocation3], %s489_s16 }
 0x1f9   : > { %p575_p2 = pnand %p578_p1, %p754_p6 }
 0x1fb   : > { %660 = dma.done.wait (!%p575_p2), %s490_s17, 256  }
 0x1fc   : > { %662 = vsyncadd (!%p575_p2), %s490_s17, 4294967040  ;;  %p15_p3 = scmp.ge.s32.totalorder %s737_s24, 4   ;;  %s850_s18 = smov %s669_s19 }
 0x1fd   : > { %s851_s19 = smov %s673_s20  ;;  %s852_s20 = smov %s748_s27 }
 0x1fe   : > { %s853_s21 = smov %s737_s24  ;;  %17 = sbr.rel (!%p15_p3) target bundleno = 3 (0x3), region = 75 }
 0x205   :  { %495 = vsyncpa [#allocation3], 1 }
 0x206   :  { %497 = vsyncpa [#allocation3 + $0x1], 1 }

</bundles_post_ra>
